<compile_context>
chip_gen: v7x
topology: tpu7x:2x2x1
jax: 0.10.0
libtpu: 0.0.40
codegen_flags: <defaults>
</compile_context>

<pallas_src>
import math

import jax
import jax.numpy as jnp
from jax.experimental import pallas as pl
from jax.experimental.pallas import tpu as pltpu


def _round_up(x, m):
    return ((x + m - 1) // m) * m


def make_mlp_kernel(num_linears):
    """Build a fused MLP kernel for `num_linears` Linear layers.

    Kernel signature: (z_ref, w0, b0, w1, b1, ..., out_ref).
    Hidden layers use tanh; the final Linear has no activation, matching
    Feedforward.forward. Matmuls run in bf16 on the MXU with f32 accumulation.
    """

    def kernel(z_ref, *refs):
        out_ref = refs[-1]
        param_refs = refs[:-1]
        z = z_ref[...]  # bf16 activation tile (TM, D0)
        for i in range(num_linears):
            w = param_refs[2 * i][...]        # bf16 (D_i, D_{i+1}), VMEM-resident
            b = param_refs[2 * i + 1][...]    # f32  (1,  D_{i+1})
            acc = jnp.dot(z, w, preferred_element_type=jnp.float32) + b
            if i < num_linears - 1:
                # f32 tanh (EUP slot), then back to bf16 for the next MXU pass.
                z = jnp.tanh(acc).astype(jnp.bfloat16)
            else:
                z = acc                        # final layer: no activation
        out_ref[...] = z.astype(out_ref.dtype)

    return kernel


def feedforward_pallas(z, weights, biases, *, tm=None):
    """Run the fused MLP Pallas kernel.

    z:       (batch, layers[0]) float32
    weights: list of (layers[i], layers[i+1]) float32 arrays (pre-transposed
             vs. PyTorch's (out, in) storage, so the kernel computes z @ W + b)
    biases:  list of (1, layers[i+1]) float32 arrays
    returns: (batch, layers[-1]) float32
    """
    num_linears = len(weights)
    batch, in_dim = z.shape
    out_dim = weights[-1].shape[1]

    # Pad every feature dim up to a multiple of 128 (lane-dense MXU / stores).
    dims = [weights[0].shape[0]] + [w.shape[1] for w in weights]
    pdims = [_round_up(d, 128) for d in dims]

    # Batch row tile: large (512) when the batch is big, otherwise the whole
    # (8-aligned) batch. Pad the batch up to a tile multiple.
    if tm is None:
        tm = min(512, _round_up(batch, 8))
    pbatch = _round_up(batch, tm)

    # Padded bf16 activations.
    zp = jnp.zeros((pbatch, pdims[0]), jnp.bfloat16)
    zp = zp.at[:batch, :in_dim].set(z.astype(jnp.bfloat16))

    # Padded bf16 weights and f32 biases, interleaved as kernel inputs.
    params = []
    param_specs = []
    for i, (w, b) in enumerate(zip(weights, biases)):
        k, n = pdims[i], pdims[i + 1]
        wp = jnp.zeros((k, n), jnp.bfloat16)
        wp = wp.at[: w.shape[0], : w.shape[1]].set(w.astype(jnp.bfloat16))
        bp = jnp.zeros((1, n), jnp.float32)
        bp = bp.at[:, : b.shape[-1]].set(b.reshape(1, -1).astype(jnp.float32))
        params += [wp, bp]
        # Constant block index => weights/biases stay resident across the grid.
        param_specs.append(pl.BlockSpec((k, n), lambda i: (0, 0)))
        param_specs.append(pl.BlockSpec((1, n), lambda i: (0, 0)))

    grid = (pbatch // tm,)
    in_specs = [pl.BlockSpec((tm, pdims[0]), lambda i: (i, 0))] + param_specs
    out_specs = pl.BlockSpec((tm, pdims[-1]), lambda i: (i, 0))

    # VMEM budget: resident params + double-buffered in/out activation tiles.
    param_bytes = sum(int(p.size) * p.dtype.itemsize for p in params)
    act_bytes = 2 * 2 * tm * max(pdims) * 4  # 2 bufs each for in & out, f32 worst case
    vmem_limit = int(min(100 << 20, max(32 << 20, 2 * (param_bytes + act_bytes))))

    out_padded = pl.pallas_call(
        make_mlp_kernel(num_linears),
        out_shape=jax.ShapeDtypeStruct((pbatch, pdims[-1]), jnp.float32),
        grid=grid,
        in_specs=in_specs,
        out_specs=out_specs,
        compiler_params=pltpu.CompilerParams(
            dimension_semantics=("parallel",),
            vmem_limit_bytes=vmem_limit,
        ),
    )(zp, *params)

    return out_padded[:batch, :out_dim]


def init_params(layers, key):
    """Xavier-uniform weights (gain=1.0), zero biases — matches the module init."""
    weights, biases = [], []
    for i in range(len(layers) - 1):
        fan_in, fan_out = layers[i], layers[i + 1]
        key, sub = jax.random.split(key)
        a = math.sqrt(6.0 / (fan_in + fan_out))  # xavier_uniform bound, gain=1.0
        # Stored as (in, out): equivalent to PyTorch's (out, in) transposed.
        w = jax.random.uniform(sub, (fan_in, fan_out), jnp.float32, -a, a)
        b = jnp.zeros((1, fan_out), jnp.float32)
        weights.append(w)
        biases.append(b)
    return weights, biases


def feedforward_reference(z, weights, biases):
    """Pure-JAX f32 reference of Feedforward.forward (tanh hidden activations)."""
    num_linears = len(weights)
    for i in range(num_linears - 1):
        z = jnp.tanh(z @ weights[i] + biases[i])
    return z @ weights[-1] + biases[-1]


if __name__ == "__main__":
    # Small synthetic config: layers = [4, 32, 32, 2], tanh hidden activations.
    layers = [4, 32, 32, 2]
    batch = 8

    key = jax.random.PRNGKey(0)
    key, zkey = jax.random.split(key)
    z = jax.random.normal(zkey, (batch, layers[0]), jnp.float32)

    weights, biases = init_params(layers, key)

    out = feedforward_pallas(z, weights, biases)
    out = jax.block_until_ready(out)

    ref = feedforward_reference(z, weights, biases)
    assert out.shape == (batch, layers[-1])
    # bf16 MXU operands with f32 accumulation -> small drift vs the f32 reference.
    assert jnp.allclose(out, ref, atol=5e-2, rtol=5e-2), (
        f"mismatch vs reference: max abs diff {jnp.max(jnp.abs(out - ref))}")

    print("KERNEL_OK")
</pallas_src>

<mosaic_0001>
module attributes {stable_mosaic.version = 11 : i64} {
  func.func @kernel(%arg0: i32, %arg1: memref<8x128xbf16, #tpu.memory_space<vmem>>, %arg2: memref<128x128xbf16, #tpu.memory_space<vmem>>, %arg3: memref<1x128xf32, #tpu.memory_space<vmem>>, %arg4: memref<128x128xbf16, #tpu.memory_space<vmem>>, %arg5: memref<1x128xf32, #tpu.memory_space<vmem>>, %arg6: memref<128x128xbf16, #tpu.memory_space<vmem>>, %arg7: memref<1x128xf32, #tpu.memory_space<vmem>>, %arg8: memref<8x128xf32, #tpu.memory_space<vmem>>) attributes {dimension_semantics = [#tpu.dimension_semantics<parallel>], iteration_bounds = array<i64: 1>, scalar_prefetch = 0 : i64, scratch_operands = 0 : i64, tpu.core_type = #tpu.core_type<tc>, window_params = [{transform_indices = @transform_0, window_bounds = array<i64: 8, 128>}, {pipeline_mode = #tpu.pipeline_mode<synchronous>, transform_indices = @transform_1, window_bounds = array<i64: 128, 128>}, {pipeline_mode = #tpu.pipeline_mode<synchronous>, transform_indices = @transform_2, window_bounds = array<i64: 1, 128>}, {pipeline_mode = #tpu.pipeline_mode<synchronous>, transform_indices = @transform_3, window_bounds = array<i64: 128, 128>}, {pipeline_mode = #tpu.pipeline_mode<synchronous>, transform_indices = @transform_4, window_bounds = array<i64: 1, 128>}, {pipeline_mode = #tpu.pipeline_mode<synchronous>, transform_indices = @transform_5, window_bounds = array<i64: 128, 128>}, {pipeline_mode = #tpu.pipeline_mode<synchronous>, transform_indices = @transform_6, window_bounds = array<i64: 1, 128>}, {transform_indices = @transform_7, window_bounds = array<i64: 8, 128>}]} {
    %c0 = arith.constant 0 : index
    %c0_0 = arith.constant 0 : index
    %0 = vector.load %arg1[%c0, %c0_0] : memref<8x128xbf16, #tpu.memory_space<vmem>>, vector<8x128xbf16>
    %c0_1 = arith.constant 0 : index
    %c0_2 = arith.constant 0 : index
    %1 = vector.load %arg2[%c0_1, %c0_2] : memref<128x128xbf16, #tpu.memory_space<vmem>>, vector<128x128xbf16>
    %c0_3 = arith.constant 0 : index
    %c0_4 = arith.constant 0 : index
    %2 = vector.load %arg3[%c0_3, %c0_4] : memref<1x128xf32, #tpu.memory_space<vmem>>, vector<1x128xf32>
    %cst = arith.constant dense<0.000000e+00> : vector<8x128xf32>
    %3 = tpu.matmul %0, %1, %cst {dimension_numbers = #tpu.dot_dimension_numbers<[1], [0], [0], [1], [0, 0, 1, 1], [], []>} : vector<8x128xbf16>, vector<128x128xbf16>, vector<8x128xf32> -> vector<8x128xf32>
    %4 = vector.broadcast %2 : vector<1x128xf32> to vector<8x128xf32>
    %5 = arith.addf %3, %4 : vector<8x128xf32>
    %6 = math.tanh %5 : vector<8x128xf32>
    %7 = arith.truncf %6 : vector<8x128xf32> to vector<8x128xbf16>
    %c0_5 = arith.constant 0 : index
    %c0_6 = arith.constant 0 : index
    %8 = vector.load %arg4[%c0_5, %c0_6] : memref<128x128xbf16, #tpu.memory_space<vmem>>, vector<128x128xbf16>
    %c0_7 = arith.constant 0 : index
    %c0_8 = arith.constant 0 : index
    %9 = vector.load %arg5[%c0_7, %c0_8] : memref<1x128xf32, #tpu.memory_space<vmem>>, vector<1x128xf32>
    %cst_9 = arith.constant dense<0.000000e+00> : vector<8x128xf32>
    %10 = tpu.matmul %7, %8, %cst_9 {dimension_numbers = #tpu.dot_dimension_numbers<[1], [0], [0], [1], [0, 0, 1, 1], [], []>} : vector<8x128xbf16>, vector<128x128xbf16>, vector<8x128xf32> -> vector<8x128xf32>
    %11 = vector.broadcast %9 : vector<1x128xf32> to vector<8x128xf32>
    %12 = arith.addf %10, %11 : vector<8x128xf32>
    %13 = math.tanh %12 : vector<8x128xf32>
    %14 = arith.truncf %13 : vector<8x128xf32> to vector<8x128xbf16>
    %c0_10 = arith.constant 0 : index
    %c0_11 = arith.constant 0 : index
    %15 = vector.load %arg6[%c0_10, %c0_11] : memref<128x128xbf16, #tpu.memory_space<vmem>>, vector<128x128xbf16>
    %c0_12 = arith.constant 0 : index
    %c0_13 = arith.constant 0 : index
    %16 = vector.load %arg7[%c0_12, %c0_13] : memref<1x128xf32, #tpu.memory_space<vmem>>, vector<1x128xf32>
    %cst_14 = arith.constant dense<0.000000e+00> : vector<8x128xf32>
    %17 = tpu.matmul %14, %15, %cst_14 {dimension_numbers = #tpu.dot_dimension_numbers<[1], [0], [0], [1], [0, 0, 1, 1], [], []>} : vector<8x128xbf16>, vector<128x128xbf16>, vector<8x128xf32> -> vector<8x128xf32>
    %18 = vector.broadcast %16 : vector<1x128xf32> to vector<8x128xf32>
    %19 = arith.addf %17, %18 : vector<8x128xf32>
    %c0_15 = arith.constant 0 : index
    %c0_16 = arith.constant 0 : index
    %20 = vector.load %arg8[%c0_15, %c0_16] : memref<8x128xf32, #tpu.memory_space<vmem>>, vector<8x128xf32>
    tpu.vector_store %arg8[%c0_15, %c0_16], %19 {strides = array<i32>} : memref<8x128xf32, #tpu.memory_space<vmem>>, vector<8x128xf32>,
    return
  }
  func.func @transform_0(%arg0: i32) -> (i32, i32) {
    %c0_i32 = arith.constant 0 : i32
    %c0_i32_0 = arith.constant 0 : i32
    return %arg0, %c0_i32 : i32, i32
  }
  func.func @transform_1(%arg0: i32) -> (i32, i32) {
    %c0_i32 = arith.constant 0 : i32
    %c0_i32_0 = arith.constant 0 : i32
    %c0_i32_1 = arith.constant 0 : i32
    return %c0_i32, %c0_i32_0 : i32, i32
  }
  func.func @transform_2(%arg0: i32) -> (i32, i32) {
    %c0_i32 = arith.constant 0 : i32
    %c0_i32_0 = arith.constant 0 : i32
    %c0_i32_1 = arith.constant 0 : i32
    return %c0_i32, %c0_i32_0 : i32, i32
  }
  func.func @transform_3(%arg0: i32) -> (i32, i32) {
    %c0_i32 = arith.constant 0 : i32
    %c0_i32_0 = arith.constant 0 : i32
    %c0_i32_1 = arith.constant 0 : i32
    return %c0_i32, %c0_i32_0 : i32, i32
  }
  func.func @transform_4(%arg0: i32) -> (i32, i32) {
    %c0_i32 = arith.constant 0 : i32
    %c0_i32_0 = arith.constant 0 : i32
    %c0_i32_1 = arith.constant 0 : i32
    return %c0_i32, %c0_i32_0 : i32, i32
  }
  func.func @transform_5(%arg0: i32) -> (i32, i32) {
    %c0_i32 = arith.constant 0 : i32
    %c0_i32_0 = arith.constant 0 : i32
    %c0_i32_1 = arith.constant 0 : i32
    return %c0_i32, %c0_i32_0 : i32, i32
  }
  func.func @transform_6(%arg0: i32) -> (i32, i32) {
    %c0_i32 = arith.constant 0 : i32
    %c0_i32_0 = arith.constant 0 : i32
    %c0_i32_1 = arith.constant 0 : i32
    return %c0_i32, %c0_i32_0 : i32, i32
  }
  func.func @transform_7(%arg0: i32) -> (i32, i32) {
    %c0_i32 = arith.constant 0 : i32
    %c0_i32_0 = arith.constant 0 : i32
    return %arg0, %c0_i32 : i32, i32
  }
}

</mosaic_0001>

<bundles_post_ra>
// kernel: tpu_custom_call.1
= control target key start
LH: loop header
LB: loop body
LE: loop exit
PB: predicated region body
PF: predicated region fallthrough
CT: control target
= control target key end

     0   :  { %12 = vsyncpa [#allocation3], 0  ;;  %s863_s0 = inlined_call_operand.hbm [shape: bf16[8,128], index: 0, kind: input, shape index: {}]   ;;  %s864_s1 = inlined_call_operand.hbm [shape: bf16[128,128], index: 1, kind: input, shape index: {}]   ;;  %s865_s2 = inlined_call_operand.vmem [shape: f32[1,128], index: 2, kind: input, shape index: {}]   ;;  %s866_s3 = inlined_call_operand.hbm [shape: bf16[128,128], index: 3, kind: input, shape index: {}]   ;;  %s867_s4 = inlined_call_operand.vmem [shape: f32[1,128], index: 4, kind: input, shape index: {}]   ;;  %s868_s5 = inlined_call_operand.hbm [shape: bf16[128,128], index: 5, kind: input, shape index: {}]   ;;  %s869_s6 = inlined_call_operand.vmem [shape: f32[1,128], index: 6, kind: input, shape index: {}]   ;;  %s870_s7 = inlined_call_operand.hbm [shape: f32[8,128], index: 7, kind: output, shape index: {}]  }
   0x1   :  { %13 = vsyncpa [#allocation6], 0 }
   0x2   :  { %14 = vsyncpa [#allocation9], 0 }
   0x3   :  { %15 = vsyncpa [#allocation4], 0  ;;  %s706_s24 = smov [#allocation5]   ;;  %s588_s28 = scalar_lea.hbm %s864_s1, 1024 }
   0x4   :  { %s31_s25 = sshll.u32 %s706_s24, 4  ;;  %p589_p0 = scmp.ne.s32.totalorder %s864_s1, %s588_s28  ;;  %s32_s25 = int_to_ptr.vmem [resolvable:$true] %s31_s25 }
   0x5   :  { %p592_p1 = scmp.lt.u32.totalorder %s588_s28, %s864_s1 }
   0x7   :  { %p594_p2 = pnand %p592_p1, %p589_p0 }
   0x9   :  { %597 = shalt.err (!%p594_p2)
}
   0xa   :  { %s598_s10 = scalar_lea.vmem %s32_s25, 1024  ;;  %p603_p4 = scmp.lt.s32.totalorder %s32_s25, %s32_s25 }
   0xb   :  { %p599_p3 = scmp.ne.s32.totalorder %s32_s25, %s598_s10  ;;  %p604_p5 = scmp.lt.s32.totalorder %s598_s10, %s598_s10 }
   0xd   :  { %p605_p6 = por %p604_p5, %p603_p4 }
   0xf   :  { %p606_p7 = pnand %p605_p6, %p599_p3 }
  0x11   :  { %609 = shalt.err (!%p606_p7)
}
  0x12   :  { %s707_s11 = smov 64   ;;  %s708_s12 = smov 4  }
  0x13   :  { %37 = dma.hbm_to_vmem [thread:$0]  %s864_s1, 1024, %s32_s25, [#allocation6], %s707_s11, %s707_s11, %s708_s12  }
  0x14   :  { %s709_s15 = smov [#allocation2]   ;;  %s710_s17 = smov [#allocation7]  }
  0x15   :  { %s22_s16 = sshll.u32 %s709_s15, 4  ;;  %s45_s18 = sshll.u32 %s710_s17, 4  ;;  %s23_s16 = int_to_ptr.vmem [resolvable:$true] %s22_s16  ;;  %s46_s18 = int_to_ptr.vmem [resolvable:$true] %s45_s18 }
  0x16   :  { %s610_s21 = scalar_lea.hbm %s863_s0, 64 }
  0x17   :  { %p611_p8 = scmp.ne.s32.totalorder %s863_s0, %s610_s21  ;;  %p614_p9 = scmp.lt.u32.totalorder %s610_s21, %s863_s0 }
  0x19   :  { %p616_p10 = pnand %p614_p9, %p611_p8 }
  0x1b   :  { %619 = shalt.err (!%p616_p10)
}
  0x1c   :  { %s620_s1 = scalar_lea.vmem %s23_s16, 64  ;;  %p625_p12 = scmp.lt.s32.totalorder %s23_s16, %s23_s16 }
  0x1d   :  { %p621_p11 = scmp.ne.s32.totalorder %s23_s16, %s620_s1  ;;  %p626_p13 = scmp.lt.s32.totalorder %s620_s1, %s620_s1 }
  0x1f   :  { %p627_p0 = por %p626_p13, %p625_p12 }
  0x21   :  { %p628_p1 = pnand %p627_p0, %p621_p11 }
  0x23   :  { %631 = shalt.err (!%p628_p1)
}
  0x24   :  { %25 = dma.hbm_to_vmem [thread:$0]  %s863_s0, 64, %s23_s16, [#allocation3]  }
  0x25   :  { %s632_s30 = scalar_lea.hbm %s866_s3, 1024 }
  0x26   :  { %p633_p2 = scmp.ne.s32.totalorder %s866_s3, %s632_s30  ;;  %p636_p3 = scmp.lt.u32.totalorder %s632_s30, %s866_s3 }
  0x28   :  { %p638_p4 = pnand %p636_p3, %p633_p2 }
  0x2a   :  { %641 = shalt.err (!%p638_p4)
}
  0x2b   :  { %s642_s14 = scalar_lea.vmem %s46_s18, 1024  ;;  %p647_p6 = scmp.lt.s32.totalorder %s46_s18, %s46_s18 }
  0x2c   :  { %p643_p5 = scmp.ne.s32.totalorder %s46_s18, %s642_s14  ;;  %p648_p7 = scmp.lt.s32.totalorder %s642_s14, %s642_s14 }
  0x2e   :  { %p649_p8 = por %p648_p7, %p647_p6 }
  0x30   :  { %p650_p9 = pnand %p649_p8, %p643_p5 }
  0x32   :  { %653 = shalt.err (!%p650_p9)
}
  0x33   :  { %51 = dma.hbm_to_vmem [thread:$0]  %s866_s3, 1024, %s46_s18, [#allocation6], %s707_s11, %s707_s11, %s708_s12  }
  0x34   :  { %s711_s16 = smov [#allocation8]   ;;  %s654_s21 = scalar_lea.hbm %s868_s5, 1024 }
  0x35   :  { %s59_s17 = sshll.u32 %s711_s16, 4  ;;  %p655_p10 = scmp.ne.s32.totalorder %s868_s5, %s654_s21  ;;  %s60_s17 = int_to_ptr.vmem [resolvable:$true] %s59_s17 }
  0x36   :  { %p658_p11 = scmp.lt.u32.totalorder %s654_s21, %s868_s5 }
  0x38   :  { %p660_p12 = pnand %p658_p11, %p655_p10 }
  0x3a   :  { %663 = shalt.err (!%p660_p12)
}
  0x3b   :  { %s664_s1 = scalar_lea.vmem %s60_s17, 1024  ;;  %p669_p0 = scmp.lt.s32.totalorder %s60_s17, %s60_s17 }
  0x3c   :  { %p665_p13 = scmp.ne.s32.totalorder %s60_s17, %s664_s1  ;;  %p670_p1 = scmp.lt.s32.totalorder %s664_s1, %s664_s1 }
  0x3e   :  { %p671_p2 = por %p670_p1, %p669_p0 }
  0x40   :  { %p672_p3 = pnand %p671_p2, %p665_p13 }
  0x42   :  { %675 = shalt.err (!%p672_p3)
}
  0x43   :  { %65 = dma.hbm_to_vmem [thread:$0]  %s868_s5, 1024, %s60_s17, [#allocation9], %s707_s11, %s707_s11, %s708_s12  }
  0x44   :  { %698 = dma.done.wait [#allocation3], 64  }
  0x45   :  { %699 = vsyncadd [#allocation3], 4294967232 }
  0x46   :  { %700 = dma.done.wait [#allocation6], 2048  }
  0x47   :  { %701 = vsyncadd [#allocation6], 4294965248 }
  0x48   :  { %702 = dma.done.wait [#allocation9], 1024  }
  0x49   :  { %703 = vsyncadd [#allocation9], 4294966272  ;;  %v712_v0 = vmov 0.0   ;;  %vm713_vm0 = vmmov 0   ;;  %v560_v1 = vld [vmem:[#allocation5] sm:$0xff]   ;;  %v561_v2 = vld [vmem:[#allocation5 + $0x8] sm:$0xff]  }
  0x4a   :  { %491 = vmatprep.subr.bf16.mxu0 %v712_v0  ;;  %507 = vmatprep.mubr.msk.bf16.mxu0 %vm713_vm0, %v712_v0  ;;  %v562_v3 = vld [vmem:[#allocation5 + $0x10] sm:$0xff]   ;;  %v568_v4 = vld [vmem:[#allocation7] sm:$0xff]   ;;  %v563_v5 = vld [vmem:[#allocation5 + $0x18] sm:$0xff]   ;;  %s714_s28 = smov [#allocation10]  }
  0x4b   :  { %511 = vmatprep.subr.bf16.mxu1 %v712_v0  ;;  %527 = vmatprep.mubr.msk.bf16.mxu1 %vm713_vm0, %v712_v0  ;;  %v569_v6 = vld [vmem:[#allocation7 + $0x8] sm:$0xff]   ;;  %v564_v7 = vld [vmem:[#allocation5 + $0x20] sm:$0xff]   ;;  %v570_v8 = vld [vmem:[#allocation7 + $0x10] sm:$0xff]   ;;  %s426_s29 = sshll.u32 %s714_s28, 4  ;;  %s427_s29 = int_to_ptr.vmem [resolvable:$true] %s426_s29 }
  0x4c   :  { %492 = vmatpush3.bf16.msra.mxu0 %v560_v1  ;;  %512 = vmatpush3.bf16.msra.mxu1 %v568_v4  ;;  %v565_v9 = vld [vmem:[#allocation5 + $0x28] sm:$0xff]   ;;  %v571_v10 = vld [vmem:[#allocation7 + $0x18] sm:$0xff]   ;;  %v566_v11 = vld [vmem:[#allocation5 + $0x30] sm:$0xff]   ;;  %p681_p5 = scmp.lt.s32.totalorder %s427_s29, %s427_s29 }
  0x4d   :  { %493 = vmatprep.subr.bf16.mxu0 %v712_v0  ;;  %513 = vmatprep.subr.bf16.mxu1 %v712_v0  ;;  %v567_v12 = vld [vmem:[#allocation5 + $0x38] sm:$0xff]   ;;  %v572_v14 = vld [vmem:[#allocation7 + $0x20] sm:$0xff]   ;;  %v573_v15 = vld [vmem:[#allocation7 + $0x28] sm:$0xff]  }
  0x4e   :  { %v81_v13 = vld [vmem:[#allocation2] sm:$0xf]  ;;  %v574_v16 = vld [vmem:[#allocation7 + $0x30] sm:$0xff]   ;;  %v576_v18 = vld [vmem:[#allocation8] sm:$0xff]  }
  0x4f   :  { %v575_v17 = vld [vmem:[#allocation7 + $0x38] sm:$0xff]   ;;  %v577_v19 = vld [vmem:[#allocation8 + $0x8] sm:$0xff]   ;;  %v578_v20 = vld [vmem:[#allocation8 + $0x10] sm:$0xff]  }
  0x50   :  { %494 = vmatpush3.bf16.msra.mxu0 %v561_v2  ;;  %514 = vmatpush3.bf16.msra.mxu1 %v569_v6  ;;  %v579_v21 = vld [vmem:[#allocation8 + $0x18] sm:$0xff]   ;;  %v580_v30 = vld [vmem:[#allocation8 + $0x20] sm:$0xff]   ;;  %v581_v31 = vld [vmem:[#allocation8 + $0x28] sm:$0xff]  }
  0x51   :  { %495 = vmatprep.subr.bf16.mxu0 %v712_v0  ;;  %515 = vmatprep.subr.bf16.mxu1 %v712_v0  ;;  %v437_v22 = vld [vmem:[%s865_s2] ss:$0 sm:$0xff]  ;;  %v582_v32 = vld [vmem:[#allocation8 + $0x30] sm:$0xff]  }
  0x52   :  { %v583_v33 = vld [vmem:[#allocation8 + $0x38] sm:$0xff]  }
  0x53   :  { %v446_v34 = vld [vmem:[%s867_s4] ss:$0 sm:$0xff]  ;;  %s676_s4 = scalar_lea.vmem %s427_s29, 128 }
  0x54   :  { %496 = vmatpush3.bf16.msra.mxu0 %v562_v3  ;;  %516 = vmatpush3.bf16.msra.mxu1 %v570_v8  ;;  %v455_v42 = vld [vmem:[%s869_s6] ss:$0 sm:$0xff]  ;;  %p677_p4 = scmp.ne.s32.totalorder %s427_s29, %s676_s4  ;;  %p682_p6 = scmp.lt.s32.totalorder %s676_s4, %s676_s4 }
  0x55   :  { %497 = vmatprep.subr.bf16.mxu0 %v712_v0  ;;  %517 = vmatprep.subr.bf16.mxu1 %v712_v0 }
  0x56   :  { %p683_p7 = por %p682_p6, %p681_p5 }
  0x58   :  { %498 = vmatpush3.bf16.msra.mxu0 %v563_v5  ;;  %518 = vmatpush3.bf16.msra.mxu1 %v571_v10  ;;  %p684_p8 = pnand %p683_p7, %p677_p4 }
  0x59   :  { %499 = vmatprep.subr.bf16.mxu0 %v712_v0  ;;  %519 = vmatprep.subr.bf16.mxu1 %v712_v0 }
  0x5c   :  { %500 = vmatpush3.bf16.msra.mxu0 %v564_v7  ;;  %520 = vmatpush3.bf16.msra.mxu1 %v572_v14 }
  0x5d   :  { %501 = vmatprep.subr.bf16.mxu0 %v712_v0  ;;  %521 = vmatprep.subr.bf16.mxu1 %v712_v0 }
  0x60   :  { %502 = vmatpush3.bf16.msra.mxu0 %v565_v9  ;;  %522 = vmatpush3.bf16.msra.mxu1 %v573_v15 }
  0x61   :  { %503 = vmatprep.subr.bf16.mxu0 %v712_v0  ;;  %523 = vmatprep.subr.bf16.mxu1 %v712_v0 }
  0x64   :  { %504 = vmatpush3.bf16.msra.mxu0 %v566_v11  ;;  %524 = vmatpush3.bf16.msra.mxu1 %v574_v16 }
  0x65   :  { %505 = vmatprep.subr.bf16.mxu0 %v712_v0  ;;  %525 = vmatprep.subr.bf16.mxu1 %v712_v0 }
  0x68   :  { %506 = vmatpush3.bf16.msra.mxu0 %v567_v12  ;;  %526 = vmatpush3.bf16.msra.mxu1 %v575_v17 }
  0x69   :  { %531 = vmatprep.subr.bf16.mxu0 %v712_v0 }
  0x6b   :  { %508 = vmatmul.mubr.bf16.vlgmr.msra.gmra.mrb[0].mxu0 %v81_v13 }
  0x6c   :  { %547 = vmatprep.mubr.msk.bf16.mxu0 %vm713_vm0, %v712_v0  ;;  %532 = vmatpush3.bf16.msra.mxu0 %v576_v18 }
  0x6d   :  { %533 = vmatprep.subr.bf16.mxu0 %v712_v0 }
  0x70   :  { %534 = vmatpush3.bf16.msra.mxu0 %v577_v19 }
  0x71   :  { %535 = vmatprep.subr.bf16.mxu0 %v712_v0 }
  0x74   :  { %536 = vmatpush3.bf16.msra.mxu0 %v578_v20 }
  0x75   :  { %537 = vmatprep.subr.bf16.mxu0 %v712_v0 }
  0x78   :  { %538 = vmatpush3.bf16.msra.mxu0 %v579_v21 }
  0x79   :  { %539 = vmatprep.subr.bf16.mxu0 %v712_v0 }
  0x7c   :  { %540 = vmatpush3.bf16.msra.mxu0 %v580_v30 }
  0x7d   :  { %541 = vmatprep.subr.bf16.mxu0 %v712_v0 }
  0x80   :  { %542 = vmatpush3.bf16.msra.mxu0 %v581_v31 }
  0x81   :  { %543 = vmatprep.subr.bf16.mxu0 %v712_v0 }
  0x84   :  { %544 = vmatpush3.bf16.msra.mxu0 %v582_v32 }
  0x85   :  { %545 = vmatprep.subr.bf16.mxu0 %v712_v0 }
  0x88   :  { %546 = vmatpush3.bf16.msra.mxu0 %v583_v33 }
 0x13e   :  { %v187_v23 = vpop.f32.mrb[0].mxu0 }
 0x13f   :  { %v188_v24 = vadd.f32 %v437_v22, %v187_v23  ;;  %v509_v25 = vpop.f32.mrb[1].mxu0 }
 0x140   :  { %v190_v26 = vpop.f32.mrb[2].mxu0 }
 0x141   :  { %584 = vtanh.f32 %v188_v24  ;;  %v510_v27 = vpop.f32.mrb[3].mxu0 }
 0x14b   :  { %v585_v28 = vpop.eup %584 }
 0x14c   :  { %v194_v29 = vpack.c.bf16 %v585_v28, %v585_v28 }
 0x14e   :  { %528 = vmatmul.mubr.bf16.vlgmr.msra.gmra.mrb[0].mxu1 %v194_v29 }
 0x221   :  { %v300_v35 = vpop.f32.mrb[0].mxu1 }
 0x222   :  { %v301_v36 = vadd.f32 %v446_v34, %v300_v35  ;;  %v529_v37 = vpop.f32.mrb[1].mxu1 }
 0x223   :  { %v303_v38 = vpop.f32.mrb[2].mxu1 }
 0x224   :  { %586 = vtanh.f32 %v301_v36  ;;  %v530_v39 = vpop.f32.mrb[3].mxu1 }
 0x22e   :  { %v587_v40 = vpop.eup %586 }
 0x22f   :  { %v307_v41 = vpack.c.bf16 %v587_v40, %v587_v40 }
 0x231   :  { %548 = vmatmul.mubr.bf16.vlgmr.msra.gmra.mrb[4].mxu0 %v307_v41 }
 0x304   :  { %v413_v43 = vpop.f32.mrb[4].mxu0 }
 0x305   :  { %v414_v44 = vadd.f32 %v455_v42, %v413_v43  ;;  %v549_v45 = vpop.f32.mrb[5].mxu0 }
 0x306   :  { %v416_v46 = vpop.f32.mrb[6].mxu0 }
 0x307   :  { %419 = vst [vmem:[#allocation10] sm:$0xff] %v414_v44  ;;  %v550_v47 = vpop.f32.mrb[7].mxu0 }
 0x308   :  { %687 = shalt.err (!%p684_p8)
}
 0x309   :  { %s688_s6 = scalar_lea.hbm %s870_s7, 128 }
 0x30a   :  { %p689_p9 = scmp.ne.s32.totalorder %s870_s7, %s688_s6  ;;  %p692_p10 = scmp.lt.u32.totalorder %s688_s6, %s870_s7 }
 0x30c   :  { %p694_p11 = pnand %p692_p10, %p689_p9 }
 0x30e   :  { %697 = shalt.err (!%p694_p11)
}
 0x30f   :  { %429 = dma.vmem_to_hbm [thread:$0]  %s427_s29, 128, %s870_s7, [#allocation4]  }
 0x310   :  { %704 = dma.done.wait [#allocation4], 128  }
 0x311   :  { %705 = vsyncadd [#allocation4], 4294967168 }
 0x312   :  { %433 = vsyncpa [#allocation3], 1 }
 0x313   :  { %434 = vsyncpa [#allocation6], 1 }
 0x314   :  { %435 = vsyncpa [#allocation9], 1 }
 0x315   :  { %436 = vsyncpa [#allocation4], 1 }

</bundles_post_ra>
